<compile_context>
chip_gen: v7x
topology: tpu7x:2x2x1
jax: 0.10.0
libtpu: 0.0.40
codegen_flags: <defaults>
</compile_context>

<pallas_src>
import functools

import jax
import jax.numpy as jnp
from jax.experimental import pallas as pl
from jax.experimental.pallas import tpu as pltpu

GAMMA = 5          # integer -> computed with explicit multiplies
ALPHA = 1.0        # FocalLoss(gamma=5, alpha=1) -> alpha tensor [1, 0]
ALPHA0 = ALPHA       # used where targets == 1
ALPHA1 = 1.0 - ALPHA # used where targets != 1

LANES = 128
MAX_TILE_ROWS = 512   # (512, 128) f32 tile = 256 KiB/input; 2 inputs x 2 bufs = 1 MiB


def _focal_loss_kernel(x_ref, t_ref, out_ref, acc_ref, *,
                       tile_rows, steps_per_p, n_elems, needs_mask):
    p = pl.program_id(0)
    j = pl.program_id(1)

    @pl.when(j == 0)
    def _():
        acc_ref[...] = jnp.zeros_like(acc_ref)

    x = x_ref[...].astype(jnp.float32)   # inputs.type_as(targets) -> float32
    t = t_ref[...].astype(jnp.float32)

    # One shared transcendental: e = exp(-|x|).
    e = jnp.exp(-jnp.abs(x))
    inv = 1.0 / (1.0 + e)
    # sigmoid(x) = 1/(1+e) for x >= 0, e/(1+e) for x < 0
    probs = jnp.where(x >= 0.0, inv, e * inv)
    # binary_cross_entropy_with_logits, reduction='none' (numerically stable):
    #   max(x, 0) - x*t + log1p(exp(-|x|))
    bce = jnp.maximum(x, 0.0) - x * t + jnp.log1p(e)

    is_one = t == 1.0
    alpha_factor = jnp.where(is_one, ALPHA0, ALPHA1)
    w = jnp.where(is_one, 1.0 - probs, probs)
    # w ** 5 via VPU multiplies (avoids exp(5*log(w)) on the single EUP slot).
    w2 = w * w
    w4 = w2 * w2
    w5 = w4 * w
    focal = alpha_factor * w5 * bce

    if needs_mask:
        row = jax.lax.broadcasted_iota(jnp.int32, (tile_rows, LANES), 0)
        lane = jax.lax.broadcasted_iota(jnp.int32, (tile_rows, LANES), 1)
        base = (p * steps_per_p + j) * tile_rows
        flat = (base + row) * LANES + lane
        focal = jnp.where(flat < n_elems, focal, 0.0)

    # Fold (tile_rows, 128) -> (8, 128) with pure elementwise vreg adds; the
    # reshape groups whole (8, 128) native tiles so it is layout-free.
    acc_ref[...] += jnp.sum(focal.reshape(tile_rows // 8, 8, LANES), axis=0)

    @pl.when(j == pl.num_programs(1) - 1)
    def _():
        # Single cross-lane/sublane reduce, once per parallel slice.
        out_ref[0, 0] = jnp.sum(acc_ref[...])


def _round_up(x, m):
    return ((x + m - 1) // m) * m


def focal_loss(inputs, targets, *, size_average=True):
    """Pallas focal loss matching FocalLoss(gamma=5, alpha=1, size_average)."""
    assert inputs.shape == targets.shape
    n_elems = int(inputs.size)

    x = jnp.ravel(inputs).astype(jnp.float32)
    t = jnp.ravel(targets).astype(jnp.float32)

    rows_needed = pl.cdiv(n_elems, LANES)
    if rows_needed <= MAX_TILE_ROWS:
        # Small problem: one block covering the whole slab, single grid step.
        num_parallel = 1
        tile_rows = max(8, _round_up(rows_needed, 8))
        steps_per_p = 1
    else:
        # Large problem: big tiles + 2-way parallel axis (both TCs on v7x).
        num_parallel = 2
        tile_rows = MAX_TILE_ROWS
        steps_per_p = pl.cdiv(rows_needed, num_parallel * tile_rows)

    padded_rows = num_parallel * steps_per_p * tile_rows
    padded_total = padded_rows * LANES
    needs_mask = padded_total != n_elems
    if needs_mask:
        pad = padded_total - n_elems
        x = jnp.pad(x, (0, pad))
        t = jnp.pad(t, (0, pad))

    x2d = x.reshape(padded_rows, LANES)
    t2d = t.reshape(padded_rows, LANES)

    kernel = functools.partial(
        _focal_loss_kernel,
        tile_rows=tile_rows,
        steps_per_p=steps_per_p,
        n_elems=n_elems,
        needs_mask=needs_mask,
    )

    in_map = lambda p, j: (p * steps_per_p + j, 0)

    partial_sums = pl.pallas_call(
        kernel,
        out_shape=jax.ShapeDtypeStruct((num_parallel, 1), jnp.float32),
        grid_spec=pltpu.PrefetchScalarGridSpec(
            num_scalar_prefetch=0,
            grid=(num_parallel, steps_per_p),
            in_specs=[
                pl.BlockSpec((tile_rows, LANES), in_map),
                pl.BlockSpec((tile_rows, LANES), in_map),
            ],
            out_specs=pl.BlockSpec(
                (1, 1), lambda p, j: (p, 0), memory_space=pltpu.SMEM
            ),
            scratch_shapes=[pltpu.VMEM((8, LANES), jnp.float32)],
        ),
        compiler_params=pltpu.CompilerParams(
            dimension_semantics=("parallel", "arbitrary"),
            vmem_limit_bytes=32 * 1024 * 1024,
        ),
    )(x2d, t2d)

    total = jnp.sum(partial_sums)
    if size_average:
        total = total / jnp.float32(n_elems)
    return total


def focal_loss_ref(inputs, targets, *, size_average=True):
    x = inputs.astype(jnp.float32)
    t = targets.astype(jnp.float32)
    probs = jax.nn.sigmoid(x)
    bce = jnp.maximum(x, 0.0) - x * t + jnp.log1p(jnp.exp(-jnp.abs(x)))
    alpha_factor = jnp.where(t == 1.0, ALPHA0, ALPHA1)
    focal_weight = jnp.where(t == 1.0, 1.0 - probs, probs)
    focal = alpha_factor * focal_weight ** float(GAMMA) * bce
    return jnp.mean(focal) if size_average else jnp.sum(focal)


if __name__ == "__main__":
    key = jax.random.PRNGKey(0)
    k1, k2, k3, k4 = jax.random.split(key, 4)

    # NCHW-shaped logits and {0,1} targets (e.g. discriminator output map).
    shape = (2, 4, 16, 16)
    inputs = jax.random.normal(k1, shape, dtype=jnp.float32) * 2.0
    targets = jax.random.bernoulli(k2, 0.5, shape).astype(jnp.float32)

    out = jax.block_until_ready(focal_loss(inputs, targets))
    ref = focal_loss_ref(inputs, targets)
    assert jnp.allclose(out, ref, rtol=1e-5, atol=1e-6), (out, ref)

    # Ragged size exercising the padding/mask path.
    shape2 = (3, 5, 17, 19)
    inputs2 = jax.random.normal(k3, shape2, dtype=jnp.float32) * 2.0
    targets2 = jax.random.bernoulli(k4, 0.5, shape2).astype(jnp.float32)

    out2 = jax.block_until_ready(focal_loss(inputs2, targets2))
    ref2 = focal_loss_ref(inputs2, targets2)
    assert jnp.allclose(out2, ref2, rtol=1e-5, atol=1e-6), (out2, ref2)

    print("KERNEL_OK")
</pallas_src>

<mosaic_0001>
module attributes {stable_mosaic.version = 11 : i64} {
  func.func @_focal_loss_kernel(%arg0: i32, %arg1: i32, %arg2: memref<16x128xf32, #tpu.memory_space<vmem>>, %arg3: memref<16x128xf32, #tpu.memory_space<vmem>>, %arg4: memref<1x1xf32, #tpu.memory_space<smem>>, %arg5: memref<8x128xf32, #tpu.memory_space<vmem>>) attributes {dimension_semantics = [#tpu.dimension_semantics<parallel>, #tpu.dimension_semantics<arbitrary>], iteration_bounds = array<i64: 1, 1>, scalar_prefetch = 0 : i64, scratch_operands = 1 : i64, tpu.core_type = #tpu.core_type<tc>, window_params = [{transform_indices = @transform_0, window_bounds = array<i64: 16, 128>}, {transform_indices = @transform_1, window_bounds = array<i64: 16, 128>}, {transform_indices = @transform_2, window_bounds = array<i64: 1, 1>}]} {
    %c0_i32 = arith.constant 0 : i32
    %0 = arith.cmpi eq, %arg1, %c0_i32 : i32
    %1 = arith.extui %0 : i1 to i32
    %c0_i32_0 = arith.constant 0 : i32
    %2 = arith.cmpi ne, %1, %c0_i32_0 : i32
    scf.if %2 {
      %cst_19 = arith.constant 0.000000e+00 : f32
      %44 = vector.broadcast %cst_19 : f32 to vector<8x128xf32>
      %c0_20 = arith.constant 0 : index
      %c0_21 = arith.constant 0 : index
      %45 = vector.load %arg5[%c0_20, %c0_21] : memref<8x128xf32, #tpu.memory_space<vmem>>, vector<8x128xf32>
      tpu.vector_store %arg5[%c0_20, %c0_21], %44 {strides = array<i32>} : memref<8x128xf32, #tpu.memory_space<vmem>>, vector<8x128xf32>,
    } else {
    }
    %c0 = arith.constant 0 : index
    %c0_1 = arith.constant 0 : index
    %3 = vector.load %arg2[%c0, %c0_1] : memref<16x128xf32, #tpu.memory_space<vmem>>, vector<16x128xf32>
    %c0_2 = arith.constant 0 : index
    %c0_3 = arith.constant 0 : index
    %4 = vector.load %arg3[%c0_2, %c0_3] : memref<16x128xf32, #tpu.memory_space<vmem>>, vector<16x128xf32>
    %5 = math.absf %3 : vector<16x128xf32>
    %cst = arith.constant 0.000000e+00 : f32
    %6 = vector.broadcast %cst : f32 to vector<16x128xf32>
    %7 = arith.subf %6, %5 : vector<16x128xf32>
    %8 = math.exp %7 : vector<16x128xf32>
    %cst_4 = arith.constant 1.000000e+00 : f32
    %9 = vector.broadcast %cst_4 : f32 to vector<16x128xf32>
    %10 = arith.addf %9, %8 : vector<16x128xf32>
    %cst_5 = arith.constant 1.000000e+00 : f32
    %11 = vector.broadcast %cst_5 : f32 to vector<16x128xf32>
    %12 = arith.divf %11, %10 : vector<16x128xf32>
    %cst_6 = arith.constant 0.000000e+00 : f32
    %13 = vector.broadcast %cst_6 : f32 to vector<16x128xf32>
    %14 = arith.cmpf oge, %3, %13 : vector<16x128xf32>
    %15 = arith.mulf %8, %12 : vector<16x128xf32>
    %16 = arith.select %14, %12, %15 : vector<16x128xi1>, vector<16x128xf32>
    %cst_7 = arith.constant 0.000000e+00 : f32
    %17 = vector.broadcast %cst_7 : f32 to vector<16x128xf32>
    %18 = arith.maximumf %3, %17 : vector<16x128xf32>
    %19 = arith.mulf %3, %4 : vector<16x128xf32>
    %20 = arith.subf %18, %19 : vector<16x128xf32>
    %21 = math.log1p %8 : vector<16x128xf32>
    %22 = arith.addf %20, %21 : vector<16x128xf32>
    %cst_8 = arith.constant 1.000000e+00 : f32
    %23 = vector.broadcast %cst_8 : f32 to vector<16x128xf32>
    %24 = arith.cmpf oeq, %4, %23 : vector<16x128xf32>
    %cst_9 = arith.constant 1.000000e+00 : f32
    %cst_10 = arith.constant 0.000000e+00 : f32
    %25 = vector.broadcast %cst_9 : f32 to vector<16x128xf32>
    %26 = vector.broadcast %cst_10 : f32 to vector<16x128xf32>
    %27 = arith.select %24, %25, %26 : vector<16x128xi1>, vector<16x128xf32>
    %cst_11 = arith.constant 1.000000e+00 : f32
    %28 = vector.broadcast %cst_11 : f32 to vector<16x128xf32>
    %29 = arith.subf %28, %16 : vector<16x128xf32>
    %30 = arith.select %24, %29, %16 : vector<16x128xi1>, vector<16x128xf32>
    %31 = arith.mulf %30, %30 : vector<16x128xf32>
    %32 = arith.mulf %31, %31 : vector<16x128xf32>
    %33 = arith.mulf %32, %30 : vector<16x128xf32>
    %34 = arith.mulf %27, %33 : vector<16x128xf32>
    %35 = arith.mulf %34, %22 : vector<16x128xf32>
    %c0_12 = arith.constant 0 : index
    %c0_13 = arith.constant 0 : index
    %36 = vector.load %arg5[%c0_12, %c0_13] : memref<8x128xf32, #tpu.memory_space<vmem>>, vector<8x128xf32>
    %37 = vector.shape_cast %35 : vector<16x128xf32> to vector<2x8x128xf32>
    %cst_14 = arith.constant dense<0.000000e+00> : vector<8x128xf32>
    %38 = vector.multi_reduction <add>, %37, %cst_14 [0] : vector<2x8x128xf32> to vector<8x128xf32>
    %39 = arith.addf %36, %38 : vector<8x128xf32>
    %c0_15 = arith.constant 0 : index
    %c0_16 = arith.constant 0 : index
    %40 = vector.load %arg5[%c0_15, %c0_16] : memref<8x128xf32, #tpu.memory_space<vmem>>, vector<8x128xf32>
    tpu.vector_store %arg5[%c0_15, %c0_16], %39 {strides = array<i32>} : memref<8x128xf32, #tpu.memory_space<vmem>>, vector<8x128xf32>,
    %c0_i32_17 = arith.constant 0 : i32
    %41 = arith.cmpi eq, %arg1, %c0_i32_17 : i32
    %42 = arith.extui %41 : i1 to i32
    %c0_i32_18 = arith.constant 0 : i32
    %43 = arith.cmpi ne, %42, %c0_i32_18 : i32
    scf.if %43 {
      %c0_19 = arith.constant 0 : index
      %c0_20 = arith.constant 0 : index
      %44 = vector.load %arg5[%c0_19, %c0_20] : memref<8x128xf32, #tpu.memory_space<vmem>>, vector<8x128xf32>
      %45 = vector.shape_cast %44 : vector<8x128xf32> to vector<1x8x128xf32>
      %cst_21 = arith.constant dense<0.000000e+00> : vector<1xf32>
      %46 = vector.multi_reduction <add>, %45, %cst_21 [1, 2] : vector<1x8x128xf32> to vector<1xf32>
      %47 = vector.shape_cast %46 : vector<1xf32> to vector<1x1x1xf32>
      %48 = vector.extract %47[0, 0, 0] : f32 from vector<1x1x1xf32>
      %c0_22 = arith.constant 0 : index
      %c0_23 = arith.constant 0 : index
      %49 = memref.load %arg4[%c0_22, %c0_23] : memref<1x1xf32, #tpu.memory_space<smem>>
      memref.store %48, %arg4[%c0_22, %c0_23] : memref<1x1xf32, #tpu.memory_space<smem>>
    } else {
    }
    return
  }
  func.func @transform_0(%arg0: i32, %arg1: i32) -> (i32, i32) {
    %c1_i32 = arith.constant 1 : i32
    %0 = arith.muli %arg0, %c1_i32 : i32
    %1 = arith.addi %0, %arg1 : i32
    %c0_i32 = arith.constant 0 : i32
    %c0_i32_0 = arith.constant 0 : i32
    return %1, %c0_i32 : i32, i32
  }
  func.func @transform_1(%arg0: i32, %arg1: i32) -> (i32, i32) {
    %c1_i32 = arith.constant 1 : i32
    %0 = arith.muli %arg0, %c1_i32 : i32
    %1 = arith.addi %0, %arg1 : i32
    %c0_i32 = arith.constant 0 : i32
    %c0_i32_0 = arith.constant 0 : i32
    return %1, %c0_i32 : i32, i32
  }
  func.func @transform_2(%arg0: i32, %arg1: i32) -> (i32, i32) {
    %c0_i32 = arith.constant 0 : i32
    %c0_i32_0 = arith.constant 0 : i32
    return %arg0, %c0_i32 : i32, i32
  }
}

</mosaic_0001>

<bundles_post_ra>
// kernel: tpu_custom_call.1
= control target key start
LH: loop header
LB: loop body
LE: loop exit
PB: predicated region body
PF: predicated region fallthrough
CT: control target
= control target key end

     0   :  { %7 = vsyncpa [#allocation4], 0  ;;  %s312_s0 = inlined_call_operand.hbm [shape: f32[16,128], index: 0, kind: input, shape index: {}]   ;;  %s313_s1 = inlined_call_operand.hbm [shape: f32[16,128], index: 1, kind: input, shape index: {}]   ;;  %s314_s2 = inlined_call_operand.hbm [shape: f32[1,1], index: 2, kind: output, shape index: {}]  }
   0x1   :  { %8 = vsyncpa [#allocation7], 0 }
   0x2   :  { %9 = vsyncpa [#allocation5], 0  ;;  %s239_s9 = smov [#allocation3]   ;;  %s179_s13 = scalar_lea.hbm %s312_s0, 256 }
   0x3   :  { %s19_s10 = sshll.u32 %s239_s9, 4  ;;  %p180_p0 = scmp.ne.s32.totalorder %s312_s0, %s179_s13  ;;  %s20_s10 = int_to_ptr.vmem [resolvable:$true] %s19_s10 }
   0x4   :  { %p183_p1 = scmp.lt.u32.totalorder %s179_s13, %s312_s0 }
   0x6   :  { %p185_p2 = pnand %p183_p1, %p180_p0 }
   0x8   :  { %188 = shalt.err (!%p185_p2)
}
   0x9   :  { %s189_s18 = scalar_lea.vmem %s20_s10, 256  ;;  %p194_p4 = scmp.lt.s32.totalorder %s20_s10, %s20_s10 }
   0xa   :  { %p190_p3 = scmp.ne.s32.totalorder %s20_s10, %s189_s18  ;;  %p195_p5 = scmp.lt.s32.totalorder %s189_s18, %s189_s18 }
   0xc   :  { %p196_p6 = por %p195_p5, %p194_p4 }
   0xe   :  { %p197_p7 = pnand %p196_p6, %p190_p3 }
  0x10   :  { %200 = shalt.err (!%p197_p7)
}
  0x11   :  { %s240_s19 = smov 128   ;;  %s241_s20 = smov 8  }
  0x12   :  { %25 = dma.hbm_to_vmem [thread:$0]  %s312_s0, 256, %s20_s10, [#allocation4], %s240_s19, %s240_s19, %s241_s20  }
  0x13   :  { %s242_s23 = smov [#allocation6]   ;;  %s201_s27 = scalar_lea.hbm %s313_s1, 256 }
  0x14   :  { %s35_s24 = sshll.u32 %s242_s23, 4  ;;  %p202_p8 = scmp.ne.s32.totalorder %s313_s1, %s201_s27  ;;  %s36_s24 = int_to_ptr.vmem [resolvable:$true] %s35_s24 }
  0x15   :  { %p205_p9 = scmp.lt.u32.totalorder %s201_s27, %s313_s1 }
  0x17   :  { %p207_p10 = pnand %p205_p9, %p202_p8 }
  0x19   :  { %210 = shalt.err (!%p207_p10)
}
  0x1a   :  { %s211_s4 = scalar_lea.vmem %s36_s24, 256  ;;  %p216_p12 = scmp.lt.s32.totalorder %s36_s24, %s36_s24 }
  0x1b   :  { %p212_p11 = scmp.ne.s32.totalorder %s36_s24, %s211_s4  ;;  %p217_p13 = scmp.lt.s32.totalorder %s211_s4, %s211_s4 }
  0x1d   :  { %p218_p0 = por %p217_p13, %p216_p12 }
  0x1f   :  { %p219_p1 = pnand %p218_p0, %p212_p11 }
  0x21   :  { %222 = shalt.err (!%p219_p1)
}
  0x22   :  { %41 = dma.hbm_to_vmem [thread:$0]  %s313_s1, 256, %s36_s24, [#allocation7], %s240_s19, %s240_s19, %s241_s20  }
  0x23   :  { %233 = dma.done.wait [#allocation4], 256  }
  0x24   :  { %234 = vsyncadd [#allocation4], 4294967040 }
  0x25   :  { %235 = dma.done.wait [#allocation7], 256  }
  0x26   :  { %236 = vsyncadd [#allocation7], 4294967040  ;;  %v57_v0 = vld [vmem:[#allocation3] sm:$0xff]  ;;  %v58_v1 = vld [vmem:[#allocation3 + $0x8] sm:$0xff]  ;;  %v243_v49 = vmov 0.0   ;;  %s223_s8 = scalar_lea.hbm %s314_s2, 16 }
  0x27   :  { %v61_v2 = vand.u32 2147483647, %v57_v0  ;;  %v62_v3 = vand.u32 2147483647, %v58_v1  ;;  %v59_v14 = vld [vmem:[#allocation6] sm:$0xff]  ;;  %v60_v16 = vld [vmem:[#allocation6 + $0x8] sm:$0xff]  ;;  %p224_p2 = scmp.ne.s32.totalorder %s314_s2, %s223_s8  ;;  %p227_p3 = scmp.lt.u32.totalorder %s223_s8, %s314_s2 }
  0x28   :  { %vm75_vm0 = vcmp.ge.f32.partialorder %v57_v0, 0.0  ;;  %v83_v17 = vmul.f32 %v59_v14, %v57_v0  ;;  %vm76_vm1 = vcmp.ge.f32.partialorder %v58_v1, 0.0  ;;  %v81_v25 = vmax.f32 %v57_v0, 0.0 }
  0x29   :  { %v63_v4 = vsub.f32 0.0, %v61_v2  ;;  %v64_v5 = vsub.f32 0.0, %v62_v3  ;;  %v82_v26 = vmax.f32 %v58_v1, 0.0  ;;  %v84_v30 = vmul.f32 %v60_v16, %v58_v1  ;;  %p229_p4 = pnand %p227_p3, %p224_p2 }
  0x2a   :  { %vm107_vm2 = vcmp.eq.f32.partialorder %v59_v14, 1.0  ;;  %vm108_vm3 = vcmp.eq.f32.partialorder %v60_v16, 1.0  ;;  %v85_v41 = vsub.f32 %v81_v25, %v83_v17 }
  0x2b   :  { %v65_v6 = vmul.f32 1.442695, %v63_v4  ;;  %v67_v7 = vmul.f32 1.442695, %v64_v5  ;;  %v86_v44 = vsub.f32 %v82_v26, %v84_v30  ;;  %v109_v50 = vsel %vm107_vm2, 1.0, %v243_v49 }
  0x2c   :  { %v110_v53 = vsel %vm108_vm3, 1.0, %v243_v49 }
  0x2d   :  { %167 = vpow2.f32 %v65_v6 }
  0x2e   :  { %169 = vpow2.f32 %v67_v7 }
  0x37   :  { %v168_v8 = vpop.eup %167 }
  0x38   :  { %v170_v9 = vpop.eup %169  ;;  %v69_v10 = vadd.f32 1.0, %v168_v8  ;;  %v90_v12 = vmul.f32 -0.5, %v168_v8  ;;  %v93_v21 = vand.u32 2147483647, %v168_v8 }
  0x39   :  { %v70_v11 = vadd.f32 1.0, %v170_v9  ;;  %v99_v13 = vmul.f32 -0.5, %v170_v9  ;;  %v102_v27 = vand.u32 2147483647, %v170_v9 }
  0x3a   :  { %171 = vrcp.f32 %v69_v10  ;;  %v91_v18 = vadd.f32 1.0, %v90_v12  ;;  %vm284_vm4 = vcmp.lt.f32.partialorder %v93_v21, 0.0004427343 }
  0x3b   :  { %173 = vrcp.f32 %v70_v11  ;;  %v100_v22 = vadd.f32 1.0, %v99_v13  ;;  %vm288_vm5 = vcmp.lt.f32.partialorder %v102_v27, 0.0004427343 }
  0x3c   :  { %175 = vlog2.f32 %v69_v10  ;;  %v92_v33 = vmul.f32 %v168_v8, %v91_v18 }
  0x3d   :  { %177 = vlog2.f32 %v70_v11  ;;  %v101_v37 = vmul.f32 %v170_v9, %v100_v22 }
  0x44   :  { %v172_v15 = vpop.eup %171 }
  0x45   :  { %v174_v19 = vpop.eup %173  ;;  %v77_v20 = vmul.f32 %v172_v15, %v168_v8 }
  0x46   :  { %v176_v23 = vpop.eup %175  ;;  %v78_v24 = vmul.f32 %v174_v19, %v170_v9 }
  0x47   :  { %v178_v28 = vpop.eup %177  ;;  %v79_v29 = vsel %vm75_vm0, %v172_v15, %v77_v20  ;;  %v89_v32 = vmul.f32 0.6931472, %v176_v23 }
  0x48   :  { %v80_v31 = vsel %vm76_vm1, %v174_v19, %v78_v24  ;;  %v111_v34 = vsub.f32 1.0, %v79_v29  ;;  %v98_v36 = vmul.f32 0.6931472, %v178_v28 }
  0x49   :  { %v112_v38 = vsub.f32 1.0, %v80_v31  ;;  %v95_v45 = vsel %vm284_vm4, %v92_v33, %v89_v32 }
  0x4a   :  { %v113_v40 = vsel %vm107_vm2, %v111_v34, %v79_v29  ;;  %v104_v47 = vsel %vm288_vm5, %v101_v37, %v98_v36  ;;  %v105_v52 = vadd.f32 %v95_v45, %v85_v41 }
  0x4b   :  { %v114_v42 = vsel %vm108_vm3, %v112_v38, %v80_v31  ;;  %v115_v43 = vmul.f32 %v113_v40, %v113_v40  ;;  %v106_v55 = vadd.f32 %v104_v47, %v86_v44 }
  0x4c   :  { %v116_v46 = vmul.f32 %v114_v42, %v114_v42 }
  0x4d   :  { %v117_v48 = vmul.f32 %v115_v43, %v115_v43 }
  0x4e   :  { %v118_v51 = vmul.f32 %v116_v46, %v116_v46 }
  0x4f   :  { %v119_v54 = vmul.f32 %v117_v48, %v113_v40 }
  0x50   :  { %v120_v56 = vmul.f32 %v118_v51, %v114_v42 }
  0x51   :  { %v121_v57 = vmul.f32 %v119_v54, %v109_v50 }
  0x52   :  { %v122_v58 = vmul.f32 %v120_v56, %v110_v53 }
  0x53   :  { %v123_v59 = vmul.f32 %v121_v57, %v105_v52 }
  0x54   :  { %v124_v60 = vmul.f32 %v122_v58, %v106_v55 }
  0x56   :  { %v126_v61 = vadd.f32 %v124_v60, %v123_v59 }
  0x58   :  { %133 = vadd.xlane.f32.xlu0 %v126_v61 }
  0xe5   :  { %v134_v62 = vpop.xlane.xlu0 %133 }
  0xe6   :  { %v135_v63 = vrot.slane %v134_v62, 4 }
  0xe8   :  { %v136_v0 = vadd.f32 %v135_v63, %v134_v62 }
  0xea   :  { %v137_v1 = vrot.slane %v136_v0, 2 }
  0xec   :  { %v138_v2 = vadd.f32 %v137_v1, %v136_v0 }
  0xee   :  { %v139_v3 = vrot.slane %v138_v2, 1 }
  0xf0   :  { %v140_v4 = vadd.f32 %v139_v3, %v138_v2 }
  0xf2   :  { %159 = vpush %v140_v4 }
 0x123   :  { %s160_s1 = spop %159 }
 0x124   :  { %143 = sst [smem:[#allocation8]] %s160_s1 }
 0x125   :  { %232 = shalt.err (!%p229_p4)
}
 0x126   :  { %s244_s13 = smov [#allocation8]  }
 0x127   :  { %151 = dma.smem_to_hbm %s244_s13, 16, %s314_s2, [#allocation5]  }
 0x128   :  { %237 = dma.done.wait [#allocation5], 16  }
 0x129   :  { %238 = vsyncadd [#allocation5], 4294967280 }
 0x12a   :  { %155 = sfence }
 0x12b   :  { %156 = vsyncpa [#allocation4], 1 }
 0x12c   :  { %157 = vsyncpa [#allocation7], 1 }
 0x12d   :  { %158 = vsyncpa [#allocation5], 1 }

</bundles_post_ra>
